<compile_context>
chip_gen: v5e
topology: v5e:2x2
jax: 0.10.0
libtpu: 0.0.40
codegen_flags: <defaults>
</compile_context>

<pallas_src>
import jax
import jax.numpy as jnp
from jax.experimental import pallas as pl
from jax.experimental.pallas import tpu as pltpu

INPUT_SIZE = 52
HIDDEN = 30
NUM_CLASSES = 22

# Batch tile size: multiple of 8.  At TB=4096 the per-step x DMA is ~832 KiB
# (well past the per-step fixed overhead) while the double-buffered, lane-padded
# f32 tiles + intermediates stay well under the raised VMEM limit on v5e/v6e/v7x.
MAX_TB = 4096
VMEM_LIMIT_BYTES = 48 * 1024 * 1024


def mlp_kernel(x_ref, w1_ref, b1_ref, w2_ref, b2_ref, o_ref):
    # fc1 + bias + ReLU, all f32 (MXU/VPU are idle relative to HBM; f32 is free)
    h = jnp.dot(x_ref[...], w1_ref[...], preferred_element_type=jnp.float32)
    h = jnp.maximum(h + b1_ref[...], 0.0)          # (TB, 30) + (1, 30) broadcast
    # fc2 + bias
    y = jnp.dot(h, w2_ref[...], preferred_element_type=jnp.float32)
    o_ref[...] = (y + b2_ref[...]).astype(o_ref.dtype)


def _round_up(n, m):
    return ((n + m - 1) // m) * m


def _pick_tile(b):
    """Tile size: multiple of 8 (sublane rule), capped at MAX_TB, and chosen so
    the grid has >= 2 steps when possible (v7x megacore sharding)."""
    if b <= 8:
        # A single block equal to the full array extent is always legal.
        return b
    return min(MAX_TB, _round_up(pl.cdiv(b, 2), 8))


def nn_forward(x, w1, b1, w2, b2):
    """x: (B, 52) f32; returns (B, 22) f32."""
    B = x.shape[0]
    tb = _pick_tile(B)
    grid = (pl.cdiv(B, tb),)   # last block may be ragged; output write is masked

    cost = pl.CostEstimate(
        flops=2 * B * (INPUT_SIZE * HIDDEN + HIDDEN * NUM_CLASSES),
        transcendentals=0,
        bytes_accessed=(
            B * INPUT_SIZE * 4                 # x (f32)
            + B * NUM_CLASSES * 4              # output (f32)
            + INPUT_SIZE * HIDDEN * 4          # w1 (f32)
            + HIDDEN * NUM_CLASSES * 4         # w2 (f32)
            + (HIDDEN + NUM_CLASSES) * 4       # biases (f32)
        ),
    )

    out = pl.pallas_call(
        mlp_kernel,
        out_shape=jax.ShapeDtypeStruct((B, NUM_CLASSES), jnp.float32),
        grid_spec=pl.GridSpec(
            grid=grid,
            in_specs=[
                pl.BlockSpec((tb, INPUT_SIZE), lambda i: (i, 0)),          # x tile
                pl.BlockSpec((INPUT_SIZE, HIDDEN), lambda i: (0, 0)),      # w1 (resident)
                pl.BlockSpec((1, HIDDEN), lambda i: (0, 0)),               # b1 (resident)
                pl.BlockSpec((HIDDEN, NUM_CLASSES), lambda i: (0, 0)),     # w2 (resident)
                pl.BlockSpec((1, NUM_CLASSES), lambda i: (0, 0)),          # b2 (resident)
            ],
            out_specs=pl.BlockSpec((tb, NUM_CLASSES), lambda i: (i, 0)),
        ),
        compiler_params=pltpu.CompilerParams(
            dimension_semantics=("parallel",),   # megacore sharding on v7x
            vmem_limit_bytes=VMEM_LIMIT_BYTES,   # larger tiles on v5e's 16 MiB default
        ),
        cost_estimate=cost,
    )(x, w1, b1, w2, b2)

    return out


def init_params(key):
    """Deterministic init mimicking PyTorch Linear default (uniform ±1/sqrt(fan_in))."""
    k1, k2, k3, k4 = jax.random.split(key, 4)
    bound1 = 1.0 / (INPUT_SIZE ** 0.5)
    bound2 = 1.0 / (HIDDEN ** 0.5)
    # store weights as (in_features, out_features)
    w1 = jax.random.uniform(k1, (INPUT_SIZE, HIDDEN), jnp.float32, -bound1, bound1)
    b1 = jax.random.uniform(k2, (1, HIDDEN), jnp.float32, -bound1, bound1)
    w2 = jax.random.uniform(k3, (HIDDEN, NUM_CLASSES), jnp.float32, -bound2, bound2)
    b2 = jax.random.uniform(k4, (1, NUM_CLASSES), jnp.float32, -bound2, bound2)
    return w1, b1, w2, b2


if __name__ == "__main__":
    key = jax.random.PRNGKey(0)
    kx, kp = jax.random.split(key)

    batch = 8
    x = jax.random.normal(kx, (batch, INPUT_SIZE), jnp.float32)
    w1, b1, w2, b2 = init_params(kp)

    out = nn_forward(x, w1, b1, w2, b2)
    out = jax.block_until_ready(out)

    # reference check in plain JAX (f32). Kernel is f32 end-to-end -> tight tol.
    ref = jnp.maximum(x @ w1 + b1, 0.0) @ w2 + b2
    assert out.shape == (batch, NUM_CLASSES)
    assert jnp.allclose(out, ref, atol=1e-2, rtol=1e-2), (
        float(jnp.max(jnp.abs(out - ref))))

    print("KERNEL_OK")
</pallas_src>

<mosaic_0001>
module attributes {stable_mosaic.version = 11 : i64} {
  func.func @mlp_kernel(%arg0: i32, %arg1: memref<8x52xf32, #tpu.memory_space<vmem>>, %arg2: memref<52x30xf32, #tpu.memory_space<vmem>>, %arg3: memref<1x30xf32, #tpu.memory_space<vmem>>, %arg4: memref<30x22xf32, #tpu.memory_space<vmem>>, %arg5: memref<1x22xf32, #tpu.memory_space<vmem>>, %arg6: memref<8x22xf32, #tpu.memory_space<vmem>>) attributes {dimension_semantics = [#tpu.dimension_semantics<parallel>], iteration_bounds = array<i64: 1>, scalar_prefetch = 0 : i64, scratch_operands = 0 : i64, tpu.core_type = #tpu.core_type<tc>, window_params = [{transform_indices = @transform_0, window_bounds = array<i64: 8, 52>}, {pipeline_mode = #tpu.pipeline_mode<synchronous>, transform_indices = @transform_1, window_bounds = array<i64: 52, 30>}, {pipeline_mode = #tpu.pipeline_mode<synchronous>, transform_indices = @transform_2, window_bounds = array<i64: 1, 30>}, {pipeline_mode = #tpu.pipeline_mode<synchronous>, transform_indices = @transform_3, window_bounds = array<i64: 30, 22>}, {pipeline_mode = #tpu.pipeline_mode<synchronous>, transform_indices = @transform_4, window_bounds = array<i64: 1, 22>}, {transform_indices = @transform_5, window_bounds = array<i64: 8, 22>}]} {
    %c0 = arith.constant 0 : index
    %c0_0 = arith.constant 0 : index
    %0 = vector.load %arg1[%c0, %c0_0] : memref<8x52xf32, #tpu.memory_space<vmem>>, vector<8x52xf32>
    %c0_1 = arith.constant 0 : index
    %c0_2 = arith.constant 0 : index
    %1 = vector.load %arg2[%c0_1, %c0_2] : memref<52x30xf32, #tpu.memory_space<vmem>>, vector<52x30xf32>
    %cst = arith.constant dense<0.000000e+00> : vector<8x30xf32>
    %2 = tpu.matmul %0, %1, %cst {dimension_numbers = #tpu.dot_dimension_numbers<[1], [0], [0], [1], [0, 0, 1, 1], [], []>} : vector<8x52xf32>, vector<52x30xf32>, vector<8x30xf32> -> vector<8x30xf32>
    %c0_3 = arith.constant 0 : index
    %c0_4 = arith.constant 0 : index
    %3 = vector.load %arg3[%c0_3, %c0_4] : memref<1x30xf32, #tpu.memory_space<vmem>>, vector<1x30xf32>
    %4 = vector.broadcast %3 : vector<1x30xf32> to vector<8x30xf32>
    %5 = arith.addf %2, %4 : vector<8x30xf32>
    %cst_5 = arith.constant 0.000000e+00 : f32
    %6 = vector.broadcast %cst_5 : f32 to vector<8x30xf32>
    %7 = arith.maximumf %5, %6 : vector<8x30xf32>
    %c0_6 = arith.constant 0 : index
    %c0_7 = arith.constant 0 : index
    %8 = vector.load %arg4[%c0_6, %c0_7] : memref<30x22xf32, #tpu.memory_space<vmem>>, vector<30x22xf32>
    %cst_8 = arith.constant dense<0.000000e+00> : vector<8x22xf32>
    %9 = tpu.matmul %7, %8, %cst_8 {dimension_numbers = #tpu.dot_dimension_numbers<[1], [0], [0], [1], [0, 0, 1, 1], [], []>} : vector<8x30xf32>, vector<30x22xf32>, vector<8x22xf32> -> vector<8x22xf32>
    %c0_9 = arith.constant 0 : index
    %c0_10 = arith.constant 0 : index
    %10 = vector.load %arg5[%c0_9, %c0_10] : memref<1x22xf32, #tpu.memory_space<vmem>>, vector<1x22xf32>
    %11 = vector.broadcast %10 : vector<1x22xf32> to vector<8x22xf32>
    %12 = arith.addf %9, %11 : vector<8x22xf32>
    %c0_11 = arith.constant 0 : index
    %c0_12 = arith.constant 0 : index
    %13 = vector.load %arg6[%c0_11, %c0_12] : memref<8x22xf32, #tpu.memory_space<vmem>>, vector<8x22xf32>
    tpu.vector_store %arg6[%c0_11, %c0_12], %12 {strides = array<i32>} : memref<8x22xf32, #tpu.memory_space<vmem>>, vector<8x22xf32>,
    return
  }
  func.func @transform_0(%arg0: i32) -> (i32, i32) {
    %c0_i32 = arith.constant 0 : i32
    %c0_i32_0 = arith.constant 0 : i32
    return %arg0, %c0_i32 : i32, i32
  }
  func.func @transform_1(%arg0: i32) -> (i32, i32) {
    %c0_i32 = arith.constant 0 : i32
    %c0_i32_0 = arith.constant 0 : i32
    %c0_i32_1 = arith.constant 0 : i32
    return %c0_i32, %c0_i32_0 : i32, i32
  }
  func.func @transform_2(%arg0: i32) -> (i32, i32) {
    %c0_i32 = arith.constant 0 : i32
    %c0_i32_0 = arith.constant 0 : i32
    %c0_i32_1 = arith.constant 0 : i32
    return %c0_i32, %c0_i32_0 : i32, i32
  }
  func.func @transform_3(%arg0: i32) -> (i32, i32) {
    %c0_i32 = arith.constant 0 : i32
    %c0_i32_0 = arith.constant 0 : i32
    %c0_i32_1 = arith.constant 0 : i32
    return %c0_i32, %c0_i32_0 : i32, i32
  }
  func.func @transform_4(%arg0: i32) -> (i32, i32) {
    %c0_i32 = arith.constant 0 : i32
    %c0_i32_0 = arith.constant 0 : i32
    %c0_i32_1 = arith.constant 0 : i32
    return %c0_i32, %c0_i32_0 : i32, i32
  }
  func.func @transform_5(%arg0: i32) -> (i32, i32) {
    %c0_i32 = arith.constant 0 : i32
    %c0_i32_0 = arith.constant 0 : i32
    return %arg0, %c0_i32 : i32, i32
  }
}

</mosaic_0001>

<bundles_post_ra>
// kernel: tpu_custom_call.1
= control target key start
LH: loop header
LB: loop body
LE: loop exit
PB: predicated region body
PF: predicated region fallthrough
CT: control target
= control target key end

     0   :  { %vm37_vm0 = vcmask 1043456   ;;  %vm74_vm1 = vcmask 1045504   ;;  %s225_s0 = inlined_call_operand.vmem [shape: f32[8,52], index: 0, kind: input, shape index: {}]   ;;  %s226_s1 = inlined_call_operand.vmem [shape: f32[52,30], index: 1, kind: input, shape index: {}]   ;;  %s227_s2 = inlined_call_operand.vmem [shape: f32[1,30], index: 2, kind: input, shape index: {}]   ;;  %s228_s3 = inlined_call_operand.vmem [shape: f32[30,22], index: 3, kind: input, shape index: {}]   ;;  %s229_s4 = inlined_call_operand.vmem [shape: f32[1,22], index: 4, kind: input, shape index: {}]   ;;  %s230_s5 = inlined_call_operand.hbm [shape: f32[8,22], index: 5, kind: output, shape index: {}]  }
   0x1   :  { %v28_v0 = vld [vmem:[%s226_s1 + $0x30] sm:$0xf]  ;;  %v27_v1 = vld [vmem:[%s226_s1 + $0x28] sm:$0xff]  ;;  %v26_v2 = vld [vmem:[%s226_s1 + $0x20] sm:$0xff] }
   0x2   :  { %116 = vmatpush.msk.msra.mxu0 %vm37_vm0, %v28_v0  ;;  %v65_v3 = vld [vmem:[%s228_s3 + $0x18] sm:$0x3f] }
   0x3   :  { %118 = vmatpush.msk.msra.mxu1 %vm74_vm1, %v65_v3  ;;  %v25_v4 = vld [vmem:[%s226_s1 + $0x18] sm:$0xff] }
   0x4   :  { %51 = vmatpush.msra.mxu0 %v27_v1 }
   0x5   :  { %10 = vsyncpa [#allocation3], 0  ;;  %v24_v5 = vld [vmem:[%s226_s1 + $0x10] sm:$0xff]  ;;  %v23_v6 = vld [vmem:[%s226_s1 + $0x8] sm:$0xff]  ;;  %vm33_vm2 = vcmask 424960   ;;  %vm70_vm3 = vcmask 244736  }
   0x6   :  { %52 = vmatpush.msra.mxu0 %v26_v2  ;;  %v22_v7 = vld [vmem:[%s226_s1] sm:$0xff]  ;;  %v64_v9 = vld [vmem:[%s228_s3 + $0x10] sm:$0xff]  ;;  %v63_v10 = vld [vmem:[%s228_s3 + $0x8] sm:$0xff]  ;;  %s149_s19 = smov [#allocation2]   ;;  %vm98_vm4 = vcmask 179200  }
   0x7   :  { %v21_v8 = vld [vmem:[%s225_s0] sm:$0xff]  ;;  %91 = vmatpush.msra.mxu1 %v64_v9  ;;  %s105_s20 = sshll.u32 %s149_s19, 4  ;;  %s106_s20 = int_to_ptr.vmem [resolvable:$true] %s105_s20 }
   0x8   :  { %53 = vmatpush.msra.mxu0 %v25_v4  ;;  %v62_v11 = vld [vmem:[%s228_s3] sm:$0xff]  ;;  %s107_s3 = sshll.u32 %s230_s5, 4  ;;  %s108_s3 = int_to_ptr.hbm [resolvable:$true] %s107_s3 }
   0x9   :  { %92 = vmatpush.msra.mxu1 %v63_v10  ;;  %v121_v12 = vld [vmem:[%s227_s2] ss:$0 sm:$0xff] }
   0xa   :  { %54 = vmatpush.msra.mxu0 %v24_v5  ;;  %v122_v16 = vld [vmem:[%s229_s4] ss:$0 sm:$0xff] }
   0xb   :  { %93 = vmatpush.msra.mxu1 %v62_v11 }
   0xc   :  { %55 = vmatpush.msra.mxu0 %v23_v6 }
   0xe   :  { %56 = vmatpush.msra.mxu0 %v22_v7 }
   0xf   :  { %117 = vmatmul.msk.f32.vlgmr.msra.gmra.mxu0 %vm33_vm2, %v21_v8 }
  0x8c   :  { %v58_v13 = vpop.f32.mrf.mxu0 }
  0x8d   :  { %v59_v14 = vadd.f32 %v121_v12, %v58_v13 }
  0x8f   :  { %v61_v15 = vmax.f32 %v59_v14, 0.0 }
  0x91   :  { %119 = vmatmul.msk.f32.vlgmr.msra.gmra.mxu1 %vm70_vm3, %v61_v15 }
 0x10e   :  { %v95_v17 = vpop.f32.mrf.mxu1 }
 0x10f   :  { %v96_v18 = vadd.f32 %v122_v16, %v95_v17 }
 0x111   :  { %99 = vst.msk [vmem:[#allocation2] sm:$0xff] %vm98_vm4, %v96_v18 }
 0x112   :  { %110 = dma.vmem_to_hbm [thread:$0]  %s106_s20, 128, %s108_s3, [#allocation3]  }
 0x113   :  { %147 = dma.done.wait [#allocation3], 128  }
 0x114   :  { %148 = vsyncadd [#allocation3], 4294967168 }
 0x115   :  { %115 = vsyncpa [#allocation3], 1 }

</bundles_post_ra>
